<compile_context>
chip_gen: v6e
topology: v6e:2x2x1
jax: 0.10.0
libtpu: 0.0.40
codegen_flags: <defaults>
</compile_context>

<pallas_src>
import jax
import jax.numpy as jnp
from jax.experimental import pallas as pl
from jax.experimental.pallas import tpu as pltpu

LANE = 128
MAX_BLOCK_ROWS = 2048   # (2048, 128) f32 = 1 MiB/block; 2 in x 2 buf + acc ~ 5 MiB VMEM
NUM_SPLITS = 2          # leading "parallel" axis (both TCs on v7x; no-op on v5e/v6e)


def _make_l1_kernel(block_rows: int, rows: int, steps_per_core: int, needs_mask: bool):
    def l1_kernel(x_ref, y_ref, out_ref, acc_ref):
        c = pl.program_id(0)
        i = pl.program_id(1)

        # Init the vector accumulator on this core's first step.
        @pl.when(i == 0)
        def _():
            acc_ref[...] = jnp.zeros_like(acc_ref)

        # Hot path: pure VPU elementwise work, no per-step reduction.
        diff = jnp.abs(x_ref[...].astype(jnp.float32)
                       - y_ref[...].astype(jnp.float32))

        if needs_mask:
            # Global (unclamped) block index; rows past `rows` (block padding
            # or duplicated clamped steps) are zeroed out.
            g = c * steps_per_core + i
            start = g * block_rows
            row_ids = jax.lax.broadcasted_iota(jnp.int32, diff.shape, 0) + start
            diff = jnp.where(row_ids < rows, diff, 0.0)

        acc_ref[...] += diff

        # Finalize: single cross-lane reduction per core, lane-dense store.
        @pl.when(i == steps_per_core - 1)
        def _():
            s = jnp.sum(acc_ref[...])
            out_ref[...] = jnp.zeros(out_ref.shape, jnp.float32) + s

    return l1_kernel


def l1_loss(x: jax.Array, y: jax.Array) -> jax.Array:
    """Pallas equivalent of torch.nn.functional.l1_loss(x, y) (mean reduction)."""
    assert x.shape == y.shape, "l1 loss x, y shape not the same"
    total_n = x.size

    xf = x.reshape(-1)
    yf = y.reshape(-1)

    if total_n % LANE != 0:
        # Rare fallback: pad only to the next lane multiple (<128 zeros,
        # |0-0| = 0 so the sum is unaffected; mean still divides by total_n).
        # TODO(synk): this path still materializes a padded copy; only fires
        # when the element count is not a multiple of 128.
        pad = LANE - (total_n % LANE)
        xf = jnp.pad(xf, (0, pad))
        yf = jnp.pad(yf, (0, pad))

    rows = xf.size // LANE
    # Contiguous reshape -> bitcast, no extra HBM traffic in the common case.
    x2d = xf.reshape(rows, LANE)
    y2d = yf.reshape(rows, LANE)

    block_rows = rows if rows <= MAX_BLOCK_ROWS else MAX_BLOCK_ROWS
    n_steps = pl.cdiv(rows, block_rows)
    steps_per_core = pl.cdiv(n_steps, NUM_SPLITS)
    needs_mask = (rows % block_rows != 0) or (n_steps % NUM_SPLITS != 0)
    last_block = n_steps - 1

    def in_index_map(c, i):
        g = c * steps_per_core + i
        # Clamp so duplicated / overhanging steps re-read a valid block;
        # the in-kernel mask zeroes their contribution.
        return (jnp.minimum(g, last_block), 0)

    kernel = _make_l1_kernel(block_rows, rows, steps_per_core, needs_mask)

    out = pl.pallas_call(
        kernel,
        out_shape=jax.ShapeDtypeStruct((NUM_SPLITS, 1, LANE), jnp.float32),
        grid_spec=pltpu.PrefetchScalarGridSpec(
            num_scalar_prefetch=0,
            grid=(NUM_SPLITS, steps_per_core),
            in_specs=[
                pl.BlockSpec((block_rows, LANE), in_index_map),
                pl.BlockSpec((block_rows, LANE), in_index_map),
            ],
            out_specs=pl.BlockSpec((1, 1, LANE), lambda c, i: (c, 0, 0)),
            scratch_shapes=[pltpu.VMEM((block_rows, LANE), jnp.float32)],
        ),
        compiler_params=pltpu.CompilerParams(
            dimension_semantics=("parallel", "arbitrary"),
        ),
        cost_estimate=pl.CostEstimate(
            flops=3 * total_n,
            transcendentals=0,
            bytes_accessed=2 * total_n * x.dtype.itemsize + NUM_SPLITS * LANE * 4,
        ),
    )(x2d, y2d)

    # Combine per-core partial sums and normalize by the true element count.
    return jnp.sum(out[:, 0, 0]) * (1.0 / float(total_n))


if __name__ == "__main__":
    key = jax.random.PRNGKey(0)

    # Primary test: small NCHW shapes consistent with the module's usage.
    kx, ky = jax.random.split(key)
    x = jax.random.normal(kx, (2, 4, 16, 16), dtype=jnp.float32)
    y = jax.random.normal(ky, (2, 4, 16, 16), dtype=jnp.float32)
    loss = l1_loss(x, y)
    jax.block_until_ready(loss)
    ref = jnp.mean(jnp.abs(x - y))
    assert jnp.allclose(loss, ref, rtol=1e-6, atol=1e-6), (loss, ref)

    # Non-128-divisible shape (exercises the small-pad fallback + masking).
    k1, k2 = jax.random.split(kx)
    xa = jax.random.normal(k1, (2, 3, 17, 19), dtype=jnp.float32)
    ya = jax.random.normal(k2, (2, 3, 17, 19), dtype=jnp.float32)
    la = l1_loss(xa, ya)
    jax.block_until_ready(la)
    assert jnp.allclose(la, jnp.mean(jnp.abs(xa - ya)), rtol=1e-6, atol=1e-6)

    # Multi-block shape (exercises the two-way split over full-size blocks).
    k3, k4 = jax.random.split(ky)
    xb = jax.random.normal(k3, (4, 8, 128, 128), dtype=jnp.float32)
    yb = jax.random.normal(k4, (4, 8, 128, 128), dtype=jnp.float32)
    lb = l1_loss(xb, yb)
    jax.block_until_ready(lb)
    assert jnp.allclose(lb, jnp.mean(jnp.abs(xb - yb)), rtol=1e-5, atol=1e-6)

    print("KERNEL_OK")
</pallas_src>

<mosaic_0001>
module attributes {stable_mosaic.version = 11 : i64} {
  func.func @l1_kernel(%arg0: i32, %arg1: i32, %arg2: memref<16x128xf32, #tpu.memory_space<vmem>>, %arg3: memref<16x128xf32, #tpu.memory_space<vmem>>, %arg4: memref<1x1x128xf32, #tpu.memory_space<vmem>>, %arg5: memref<16x128xf32, #tpu.memory_space<vmem>>) attributes {dimension_semantics = [#tpu.dimension_semantics<parallel>, #tpu.dimension_semantics<arbitrary>], iteration_bounds = array<i64: 2, 1>, scalar_prefetch = 0 : i64, scratch_operands = 1 : i64, tpu.core_type = #tpu.core_type<tc>, window_params = [{transform_indices = @transform_0, window_bounds = array<i64: 16, 128>}, {transform_indices = @transform_1, window_bounds = array<i64: 16, 128>}, {transform_indices = @transform_2, window_bounds = array<i64: 1, 1, 128>}]} {
    %c0_i32 = arith.constant 0 : i32
    %0 = arith.cmpi eq, %arg1, %c0_i32 : i32
    %1 = arith.extui %0 : i1 to i32
    %c0_i32_0 = arith.constant 0 : i32
    %2 = arith.cmpi ne, %1, %c0_i32_0 : i32
    scf.if %2 {
      %cst_11 = arith.constant 0.000000e+00 : f32
      %23 = vector.broadcast %cst_11 : f32 to vector<16x128xf32>
      %c0_12 = arith.constant 0 : index
      %c0_13 = arith.constant 0 : index
      %24 = vector.load %arg5[%c0_12, %c0_13] : memref<16x128xf32, #tpu.memory_space<vmem>>, vector<16x128xf32>
      tpu.vector_store %arg5[%c0_12, %c0_13], %23 {strides = array<i32>} : memref<16x128xf32, #tpu.memory_space<vmem>>, vector<16x128xf32>,
    } else {
    }
    %c0 = arith.constant 0 : index
    %c0_1 = arith.constant 0 : index
    %3 = vector.load %arg2[%c0, %c0_1] : memref<16x128xf32, #tpu.memory_space<vmem>>, vector<16x128xf32>
    %c0_2 = arith.constant 0 : index
    %c0_3 = arith.constant 0 : index
    %4 = vector.load %arg3[%c0_2, %c0_3] : memref<16x128xf32, #tpu.memory_space<vmem>>, vector<16x128xf32>
    %5 = arith.subf %3, %4 : vector<16x128xf32>
    %6 = math.absf %5 : vector<16x128xf32>
    %c1_i32 = arith.constant 1 : i32
    %7 = arith.muli %arg0, %c1_i32 : i32
    %8 = arith.addi %7, %arg1 : i32
    %c16_i32 = arith.constant 16 : i32
    %9 = arith.muli %8, %c16_i32 : i32
    %10 = tpu.iota {dimensions = array<i32: 0>} : vector<16x128xi32>
    %11 = vector.broadcast %9 : i32 to vector<16x128xi32>
    %12 = arith.addi %10, %11 : vector<16x128xi32>
    %c16_i32_4 = arith.constant 16 : i32
    %13 = vector.broadcast %c16_i32_4 : i32 to vector<16x128xi32>
    %14 = arith.cmpi slt, %12, %13 : vector<16x128xi32>
    %cst = arith.constant 0.000000e+00 : f32
    %15 = vector.broadcast %cst : f32 to vector<16x128xf32>
    %16 = arith.select %14, %6, %15 : vector<16x128xi1>, vector<16x128xf32>
    %c0_5 = arith.constant 0 : index
    %c0_6 = arith.constant 0 : index
    %17 = vector.load %arg5[%c0_5, %c0_6] : memref<16x128xf32, #tpu.memory_space<vmem>>, vector<16x128xf32>
    %18 = arith.addf %17, %16 : vector<16x128xf32>
    %c0_7 = arith.constant 0 : index
    %c0_8 = arith.constant 0 : index
    %19 = vector.load %arg5[%c0_7, %c0_8] : memref<16x128xf32, #tpu.memory_space<vmem>>, vector<16x128xf32>
    tpu.vector_store %arg5[%c0_7, %c0_8], %18 {strides = array<i32>} : memref<16x128xf32, #tpu.memory_space<vmem>>, vector<16x128xf32>,
    %c0_i32_9 = arith.constant 0 : i32
    %20 = arith.cmpi eq, %arg1, %c0_i32_9 : i32
    %21 = arith.extui %20 : i1 to i32
    %c0_i32_10 = arith.constant 0 : i32
    %22 = arith.cmpi ne, %21, %c0_i32_10 : i32
    scf.if %22 {
      %c0_11 = arith.constant 0 : index
      %c0_12 = arith.constant 0 : index
      %23 = vector.load %arg5[%c0_11, %c0_12] : memref<16x128xf32, #tpu.memory_space<vmem>>, vector<16x128xf32>
      %24 = vector.shape_cast %23 : vector<16x128xf32> to vector<1x16x128xf32>
      %cst_13 = arith.constant dense<0.000000e+00> : vector<1xf32>
      %25 = vector.multi_reduction <add>, %24, %cst_13 [1, 2] : vector<1x16x128xf32> to vector<1xf32>
      %26 = vector.shape_cast %25 : vector<1xf32> to vector<1x1x1xf32>
      %27 = vector.extract %26[0, 0, 0] : f32 from vector<1x1x1xf32>
      %cst_14 = arith.constant 0.000000e+00 : f32
      %28 = vector.broadcast %cst_14 : f32 to vector<1x1x128xf32>
      %29 = vector.broadcast %27 : f32 to vector<1x1x128xf32>
      %30 = arith.addf %28, %29 : vector<1x1x128xf32>
      %c0_15 = arith.constant 0 : index
      %c0_16 = arith.constant 0 : index
      %c0_17 = arith.constant 0 : index
      %31 = vector.load %arg4[%c0_15, %c0_16, %c0_17] : memref<1x1x128xf32, #tpu.memory_space<vmem>>, vector<1x1x128xf32>
      tpu.vector_store %arg4[%c0_15, %c0_16, %c0_17], %30 {strides = array<i32>} : memref<1x1x128xf32, #tpu.memory_space<vmem>>, vector<1x1x128xf32>,
    } else {
    }
    return
  }
  func.func @transform_0(%arg0: i32, %arg1: i32) -> (i32, i32) {
    %c1_i32 = arith.constant 1 : i32
    %0 = arith.muli %arg0, %c1_i32 : i32
    %1 = arith.addi %0, %arg1 : i32
    %c0_i32 = arith.constant 0 : i32
    %2 = arith.minsi %1, %c0_i32 : i32
    %c0_i32_0 = arith.constant 0 : i32
    %c0_i32_1 = arith.constant 0 : i32
    return %2, %c0_i32_0 : i32, i32
  }
  func.func @transform_1(%arg0: i32, %arg1: i32) -> (i32, i32) {
    %c1_i32 = arith.constant 1 : i32
    %0 = arith.muli %arg0, %c1_i32 : i32
    %1 = arith.addi %0, %arg1 : i32
    %c0_i32 = arith.constant 0 : i32
    %2 = arith.minsi %1, %c0_i32 : i32
    %c0_i32_0 = arith.constant 0 : i32
    %c0_i32_1 = arith.constant 0 : i32
    return %2, %c0_i32_0 : i32, i32
  }
  func.func @transform_2(%arg0: i32, %arg1: i32) -> (i32, i32, i32) {
    %c0_i32 = arith.constant 0 : i32
    %c0_i32_0 = arith.constant 0 : i32
    %c0_i32_1 = arith.constant 0 : i32
    return %arg0, %c0_i32, %c0_i32_0 : i32, i32, i32
  }
}

</mosaic_0001>

<bundles_post_ra>
// kernel: tpu_custom_call.1
= control target key start
LH: loop header
LB: loop body
LE: loop exit
PB: predicated region body
PF: predicated region fallthrough
CT: control target
= control target key end

     0   :  { %7 = vsyncpa [#allocation4], 0  ;;  %s890_s0 = inlined_call_operand.hbm [shape: f32[16,128], index: 0, kind: input, shape index: {}]   ;;  %s891_s1 = inlined_call_operand.hbm [shape: f32[16,128], index: 1, kind: input, shape index: {}]   ;;  %s892_s2 = inlined_call_operand.hbm [shape: f32[2,1,128], index: 2, kind: output, shape index: {}]  }
   0x1   :  { %9 = vsyncpa [#allocation4 + $0x1], 0 }
   0x2   :  { %10 = vsyncpa [#allocation7], 0 }
   0x3   :  { %12 = vsyncpa [#allocation7 + $0x1], 0 }
   0x4   :  { %13 = vsyncpa [#allocation5], 0 }
   0x5   :  { %15 = vsyncpa [#allocation5 + $0x1], 0  ;;  %s696_s9 = smov 0   ;;  %s698_s10 = smov 0  }
   0x6   :  { %s700_s11 = smov 0   ;;  %s702_s12 = smov 0  }
   0x7   :  { %s704_s13 = smov 0   ;;  %s706_s14 = smov 0  }
   0x8   :  { %s708_s15 = smov 0   ;;  %s710_s16 = smov 0  }
   0x9 LB: > { %s399_s17 = sadd.s32 4294967295, %s674_s16   ;;  %s400_s18 = sadd.s32 4294967294, %s674_s16   ;;  %s674_s16 = sphi %s710_s16, %s21_s16   ;;  %s670_s15 = sphi %s708_s15, %s911_s15   ;;  %s666_s14 = sphi %s706_s14, %s910_s14   ;;  %s662_s13 = sphi %s704_s13, %s880_s13   ;;  %s658_s12 = sphi %s702_s12, %s909_s12   ;;  %s654_s11 = sphi %s700_s11, %s908_s11   ;;  %s650_s10 = sphi %s698_s10, %s907_s10   ;;  %s646_s9 = sphi %s696_s9, %s906_s9  }
   0xa   : > { %s33_s19 = sadd.s32 1, %s670_s15  ;;  %p643_p1 = scmp.ne.s32.totalorder %s662_s13, 0 }
   0xb   : > { %p35_p0 = scmp.ge.s32.totalorder %s33_s19, 2  ;;  %p54_p2 = scmp.eq.s32.totalorder %s674_s16, 0 }
   0xc   : > { %p59_p3 = scmp.ne.s32.totalorder %s662_s13, %s658_s12  ;;  %p60_p5 = scmp.eq.s32.totalorder %s399_s17, 0 }
   0xd   : > { %s913_s19 = smov (%p35_p0, %s33_s19), 0  ;;  %p742_p4 = por %p643_p1, %p54_p2 }
   0xe   : > { %p746_p6 = por %p60_p5, %p59_p3  ;;  %s101_s22 = ssub.s32 %s670_s15, %s913_s19 }
   0xf   : > { %p102_p7 = scmp.eq.s32.totalorder %s101_s22, 0  ;;  %s104_s23 = sadd.s32 1, %s654_s11 }
  0x10   : > { %s896_s21 = scalar_select %p746_p6, 1, 0 }
  0x11   : > { %s754_s24 = scalar_select %p102_p7, %s654_s11, %s104_s23  }
  0x12   : > { %p114_p8 = scmp.ne.s32.totalorder %s654_s11, %s650_s10  ;;  %p115_p9 = scmp.eq.s32.totalorder %s399_s17, 1 }
  0x13   : > { %p120_p10 = scmp.ne.s32.totalorder %s650_s10, %s646_s9  ;;  %p121_p11 = scmp.eq.s32.totalorder %s400_s18, 1 }
  0x14   : > { %p760_p12 = por %p115_p9, %p114_p8  ;;  %p437_p1 = scmp.lt.s32.totalorder %s674_s16, 2 }
  0x15   : > { %p765_p0 = por %p121_p11, %p120_p10  ;;  %s676_s27 = smov [#allocation3]  }
  0x16   : > { %s897_s25 = scalar_select %p760_p12, 1, 0 }
  0x17   : > { %s898_s26 = scalar_select %p765_p0, 1, 0 }
  0x18   : > { %s155_s28 = sshll.u32 %s676_s27, 4  ;;  %p772_p2 = pnand %p437_p1, %p742_p4  ;;  %s156_s28 = int_to_ptr.vmem [resolvable:$true] %s155_s28 }
  0x19   : > { %s513_s4 = scalar_lea.hbm %s890_s0, 256 }
  0x1a   : > { %p514_p3 = scmp.ne.s32.totalorder %s890_s0, %s513_s4  ;;  %p515_p5 = pneg %p772_p2 }
  0x1b   : > { %p520_p8 = scmp.lt.s32.totalorder %s513_s4, %s513_s4 }
  0x1c   : > { %p516_p7 = pnand %p515_p5, %p514_p3 }
  0x1e   : > { %p517_p4 = pneg %p516_p7 }
  0x20   : > { %p522_p9 = pnand %p520_p8, %p517_p4 }
  0x22   : > { %525 = shalt.err (!%p522_p9)
}
  0x23   : > { %s526_s7 = scalar_lea.vmem %s156_s28, 256  ;;  %s533_s8 = scalar_lea.vmem %s156_s28, 512 }
  0x24   : > { %p527_p10 = scmp.ne.s32.totalorder %s156_s28, %s526_s7  ;;  %p534_p13 = scmp.lt.s32.totalorder %s156_s28, %s156_s28 }
  0x25   : > { %p535_p0 = scmp.lt.s32.totalorder %s533_s8, %s526_s7 }
  0x26   : > { %p529_p11 = pnand %p527_p10, %p515_p5 }
  0x27   : > { %p536_p12 = por %p535_p0, %p534_p13 }
  0x28   : > { %p530_p1 = pneg %p529_p11 }
  0x2a   : > { %p537_p6 = pnand %p536_p12, %p530_p1 }
  0x2c   : > { %540 = shalt.err (!%p537_p6)
}
  0x2d   : > { %s677_s12 = smov 128   ;;  %s678_s17 = smov 8  }
  0x2e   : > { %429 = dma.hbm_to_vmem [thread:$0]  (!%p772_p2), %s890_s0, 256, %s156_s28, [#allocation4], %s677_s12, %s677_s12, %s678_s17  }
  0x2f   : > { %p409_p3 = scmp.ge.s32.totalorder %s674_s16, 1  ;;  %p187_p7 = scmp.lt.s32.totalorder %s674_s16, 3 }
  0x30   : > { %s679_s23 = smov [#allocation6]   ;;  %s541_s4 = scalar_lea.hbm %s891_s1, 256 }
  0x31   : > { %p797_p4 = pnand %p409_p3, %p187_p7  ;;  %s179_s27 = sshll.u32 %s679_s23, 4  ;;  %s180_s27 = int_to_ptr.vmem [resolvable:$true] %s179_s27 }
  0x32   : > { %p542_p6 = scmp.ne.s32.totalorder %s891_s1, %s541_s4  ;;  %p548_p0 = scmp.lt.s32.totalorder %s541_s4, %s541_s4 }
  0x33   : > { %s900_s22 = scalar_select %p797_p4, 1, 0 }
  0x34   : > { %p544_p12 = pnand %p542_p6, %p515_p5 }
  0x36   : > { %p545_p13 = pneg %p544_p12 }
  0x38   : > { %p550_p8 = pnand %p548_p0, %p545_p13 }
  0x3a   : > { %553 = shalt.err (!%p550_p8)
}
  0x3b   : > { %s554_s28 = scalar_lea.vmem %s180_s27, 256  ;;  %s561_s7 = scalar_lea.vmem %s180_s27, 512 }
  0x3c   : > { %p555_p9 = scmp.ne.s32.totalorder %s180_s27, %s554_s28  ;;  %p562_p1 = scmp.lt.s32.totalorder %s180_s27, %s180_s27 }
  0x3d   : > { %p563_p3 = scmp.lt.s32.totalorder %s561_s7, %s554_s28 }
  0x3e   : > { %p557_p10 = pnand %p555_p9, %p515_p5 }
  0x3f   : > { %p564_p7 = por %p563_p3, %p562_p1 }
  0x40   : > { %p558_p11 = pneg %p557_p10 }
  0x42   : > { %p565_p4 = pnand %p564_p7, %p558_p11 }
  0x44   : > { %568 = shalt.err (!%p565_p4)
}
  0x45   : > { %432 = dma.hbm_to_vmem [thread:$0]  (!%p772_p2), %s891_s1, 256, %s180_s27, [#allocation7], %s677_s12, %s677_s12, %s678_s17  }
  0x46   : > { %p901_p6 = scmp.ne.s32.totalorder %s900_s22, 0 }
  0x47   : > { %s193_s20 = sand.u32 (!%p901_p6), 1, %s662_s13   ;;  %p902_p5 = scmp.ne.s32.totalorder (!%p901_p6), %s896_s21, 0 }
  0x48   : > { %191 = sbr.rel (%p901_p6) target bundleno = 306 (0x132), region = 28  ;;  %s410_s23 = sshll.u32 (!%p901_p6), %s193_s20, 4 }
  0x49   : > { %s194_s30 = scalar_lea.sflag (!%p901_p6), [#allocation4], %s193_s20  ;;  %s197_s3 = scalar_lea.vmem (!%p901_p6), [#allocation3], %s410_s23 }
  0x4d   : > { %632 = dma.done.wait (%p902_p5), %s194_s30, 256  }
  0x4e   : > { %634 = vsyncadd (%p902_p5), %s194_s30, 4294967040  ;;  %s203_s29 = scalar_lea.sflag [#allocation7], %s193_s20  ;;  %s206_s4 = scalar_lea.vmem [#allocation6], %s410_s23 }
  0x4f   : > { %636 = dma.done.wait (%p902_p5), %s203_s29, 256  }
  0x50   : > { %638 = vsyncadd (%p902_p5), %s203_s29, 4294967040  ;;  %s412_s12 = sshll.u32 %s666_s14, 4  ;;  %v255_v0 = vlaneseq  ;;  %v245_v6 = vld [vmem:[%s197_s3] sm:$0xff]  ;;  %v246_v7 = vld [vmem:[%s197_s3 + $0x8] sm:$0xff]  ;;  %s229_s21 = sand.u32 1, %s650_s10  }
  0x51   : > { %v258_v2 = vstv %s412_s12  ;;  %v247_v8 = vld [vmem:[%s206_s4] sm:$0xff]  ;;  %v248_v9 = vld [vmem:[%s206_s4 + $0x8] sm:$0xff]  ;;  %s230_s17 = scalar_lea.vmem [#allocation8], %s229_s21  ;;  %s838_s6 = scalar_lea.hbm %s892_s2, %s412_s12 }
  0x52   : > { %v256_v1 = vshrl.u32 %v255_v0, 7  ;;  %v249_v10 = vsub.f32 %v245_v6, %v247_v8  ;;  %v250_v11 = vsub.f32 %v246_v7, %v248_v9  ;;  %s302_s22 = sshll.u32 %s230_s17, 4  ;;  %s290_s7 = scalar_lea.sflag [#allocation5], %s229_s21  ;;  %s840_s22 = int_to_ptr.vmem [resolvable:$true] %s302_s22 }
  0x53   : > { %s569_s8 = scalar_lea.vmem %s840_s22, 16  ;;  %p903_p4 = scmp.ne.s32.totalorder %s897_s25, 0 }
  0x54   : > { %v257_v3 = vadd.s32 8, %v256_v1  ;;  %v259_v4 = vadd.s32 %v258_v2, %v256_v1  ;;  %v251_v12 = vand.u32 2147483647, %v249_v10  ;;  %v252_v13 = vand.u32 2147483647, %v250_v11  ;;  %p570_p2 = scmp.ne.s32.totalorder %s840_s22, %s569_s8  ;;  %s680_s14 = smov [#allocation8]  }
  0x55   : > { %s573_s18 = sshll.u32 %s680_s14, 4  ;;  %s574_s18 = int_to_ptr.vmem [resolvable:$false] %s573_s18 }
  0x56   : > { %v260_v5 = vadd.s32 %v258_v2, %v257_v3  ;;  %vm261_vm0 = vcmp.lt.s32.totalorder %v259_v4, 16  ;;  %p571_p12 = pnand %p570_p2, %p903_p4  ;;  %s575_s20 = scalar_lea.vmem %s574_s18, 32 }
  0x57   : > { %v263_v14 = vsel %vm261_vm0, %v251_v12, 0.0  ;;  %p576_p0 = scmp.lt.s32.totalorder %s840_s22, %s574_s18  ;;  %p577_p8 = scmp.lt.s32.totalorder %s575_s20, %s569_s8 }
  0x58   : > { %vm262_vm1 = vcmp.lt.s32.totalorder %v260_v5, 16  ;;  %p572_p13 = pneg %p571_p12 }
  0x59   : > { %v264_v15 = vsel %vm262_vm1, %v252_v13, 0.0  ;;  %p578_p9 = por %p577_p8, %p576_p0 }
  0x5a   : > { %v276_v16 = vadd.f32 %v264_v15, %v263_v14 }
  0x5b   : > { %p579_p10 = pnand %p578_p9, %p572_p13 }
  0x5c   : > { %277 = vadd.xlane.f32.xlu0 %v276_v16 }
  0xe5   : > { %v278_v17 = vpop.xlane.xlu0 %277 }
  0xe6   : > { %v279_v18 = vrot.slane %v278_v17, 4 }
  0xe8   : > { %v280_v19 = vadd.f32 %v279_v18, %v278_v17 }
  0xea   : > { %v281_v20 = vrot.slane %v280_v19, 2 }
  0xec   : > { %v282_v21 = vadd.f32 %v281_v20, %v280_v19 }
  0xee   : > { %v283_v22 = vrot.slane %v282_v21, 1 }
  0xf0   : > { %v284_v23 = vadd.f32 %v283_v22, %v282_v21 }
  0xf2   : > { %418 = vpush %v284_v23 }
 0x123   : > { %s419_s28 = spop %418 }
 0x124   : > { %v286_v24 = vstv %s419_s28 }
 0x125   : > { %288 = vst [vmem:[%s230_s17] sm:$0x1] %v286_v24 }
 0x126   : > { %582 = shalt.err (!%p579_p10)
}
 0x127   : > { %s583_s23 = scalar_lea.hbm %s838_s6, 16  ;;  %s587_s29 = scalar_lea.hbm %s892_s2, 32 }
 0x128   : > { %p584_p11 = scmp.ne.s32.totalorder %s838_s6, %s583_s23  ;;  %p588_p7 = scmp.lt.s32.totalorder %s838_s6, %s892_s2 }
 0x129   : > { %p589_p6 = scmp.lt.s32.totalorder %s587_s29, %s583_s23 }
 0x12a   : > { %p585_p1 = pnand %p584_p11, %p903_p4 }
 0x12b   : > { %p590_p5 = por %p589_p6, %p588_p7 }
 0x12c   : > { %p586_p3 = pneg %p585_p1 }
 0x12e   : > { %p591_p2 = pnand %p590_p5, %p586_p3 }
 0x130   : > { %594 = shalt.err (!%p591_p2)
}
 0x131   : > { %424 = dma.vmem_to_hbm [thread:$0]  (%p903_p4), %s840_s22, 16, %s838_s6, %s290_s7  }
 0x132 PF: > { %s314_s21 = sand.u32 1, %s646_s9   ;;  %p904_p12 = scmp.ne.s32.totalorder %s898_s26, 0 }
 0x133   : > { %p905_p13 = scmp.ge.s32.totalorder %s674_s16, 2  ;;  %s315_s17 = scalar_lea.sflag [#allocation5], %s314_s21 }
 0x135   : > { %p434_p0 = pnand %p905_p13, %p904_p12 }
 0x137   : > { %p435_p8 = pneg %p434_p0 }
 0x139   : > { %640 = dma.done.wait (%p435_p8), %s315_s17, 16  }
 0x13a   : > { %642 = vsyncadd (%p435_p8), %s315_s17, 4294967280  ;;  %s21_s16 = sadd.s32 1, %s674_s16   ;;  %s906_s9 = smov %s650_s10 }
 0x13b   : > { %p18_p9 = scmp.ge.s32.totalorder %s21_s16, 4   ;;  %s907_s10 = smov %s654_s11 }
 0x13c   : > { %s908_s11 = smov %s754_s24  ;;  %s909_s12 = smov %s662_s13 }
 0x13d   : > { %s880_s13 = smov 0   ;;  %s910_s14 = smov %s670_s15 }
 0x13e   : > { %s911_s15 = smov %s913_s19  ;;  %20 = sbr.rel (!%p18_p9) target bundleno = 9 (0x9), region = 94 }
 0x143   :  { %319 = vsyncpa [#allocation4], 1 }
 0x144   :  { %321 = vsyncpa [#allocation4 + $0x1], 1 }
 0x145   :  { %322 = vsyncpa [#allocation7], 1 }
 0x146   :  { %324 = vsyncpa [#allocation7 + $0x1], 1 }
 0x147   :  { %325 = vsyncpa [#allocation5], 1 }
 0x148   :  { %327 = vsyncpa [#allocation5 + $0x1], 1 }

</bundles_post_ra>
